<compile_context>
chip_gen: v6e
topology: v6e:2x2x1
jax: 0.10.0
libtpu: 0.0.40
codegen_flags: <defaults>
</compile_context>

<pallas_src>
import jax
import jax.numpy as jnp
from jax.experimental import pallas as pl
from jax.experimental.pallas import tpu as pltpu

LANE = 128  # vreg lane width; H/N padding multiple (keep 128 on v5e/v6e/v7x)


def _round_up(n, m):
    return ((n + m - 1) // m) * m


def _pad2d(a, rows, cols):
    return jnp.pad(a, ((0, rows - a.shape[0]), (0, cols - a.shape[1])))


def bpnn_kernel(x_ref, w01_ref, b01_ref, w2_ref, b2_ref, o_ref):
    # x arrives at its true (unpadded) feature width in f32; cast to bf16 in VMEM so
    # no extra HBM pass is spent padding/casting it host-side.
    x = x_ref[...].astype(w01_ref.dtype)
    # Folded layers 0+1 (no nonlinearity between them in the original module),
    # f32 accumulation, f32 bias add + ReLU (v5e has no bf16 VALU).
    h = jnp.dot(x, w01_ref[...], preferred_element_type=jnp.float32)
    h = jnp.maximum(h + b01_ref[...], 0.0)
    # Final Linear: hidden -> output (output padded to 128 lanes -> lane-dense store).
    o = jnp.dot(h.astype(w2_ref.dtype), w2_ref[...], preferred_element_type=jnp.float32)
    o_ref[...] = (o + b2_ref[...]).astype(o_ref.dtype)  # bf16 writeback (half the bytes)


def prepare_params(params, compute_dtype=jnp.bfloat16):
    """One-time prep: fold the first two Linears, pad H/N to 128 lanes, cast to bf16.

    The input feature dim K is deliberately left unpadded: the x stream dominates HBM
    traffic and the MXU pads the contraction internally for free.
    """
    (w0, b0), (w1, b1), (w2, b2) = params
    b0 = jnp.reshape(b0, (1, -1))  # accept (out,) or (1, out) biases
    b1 = jnp.reshape(b1, (1, -1))
    b2 = jnp.reshape(b2, (1, -1))
    w01 = w0 @ w1                   # (K, H)  exact algebraic fold (f32)
    b01 = b0 @ w1 + b1              # (1, H)
    K, H = w01.shape
    N = w2.shape[1]
    Hp, Np = _round_up(H, LANE), _round_up(N, LANE)
    w01p = _pad2d(w01, K, Hp).astype(compute_dtype)   # K unpadded; padded H cols are 0
    b01p = _pad2d(b01, 1, Hp).astype(jnp.float32)     # relu(0 + 0) = 0 -> padding inert
    w2p = _pad2d(w2, Hp, Np).astype(compute_dtype)    # padded rows/cols are zero
    b2p = _pad2d(b2, 1, Np).astype(jnp.float32)
    return (w01p, b01p, w2p, b2p), (K, N)


def bpnn_forward(x, prepared, logical_dims, tm=2048, min_pallas_batch=128):
    w01p, b01p, w2p, b2p = prepared
    K, N = logical_dims
    B = x.shape[0]
    Hp = w01p.shape[1]
    Np = w2p.shape[1]

    if B < min_pallas_batch:
        # Tiny batch: a 1-step Pallas grid is all fixed overhead; let XLA fuse the
        # two small matmuls directly.
        h = jnp.maximum(x @ w01p.astype(jnp.float32) + b01p, 0.0)
        return (h @ w2p.astype(jnp.float32) + b2p)[:, :N]

    # Batch tile: big enough to amortize the ~0.35 us/step overhead, but capped at
    # ceil(B/2) so the grid always has >= 2 steps (keeps both v7x TensorCores busy).
    TM = min(tm, _round_up(max(pl.cdiv(B, 2), 8), 8))
    grid_m = pl.cdiv(B, TM)
    # Ragged last tile (Pallas clips boundary blocks) -> no zero-row batch padding in
    # HBM.  Shrink TM if the partial tile would waste >25% extra (compute-only) work.
    while TM > 8 and (grid_m * TM - B) * 4 > B:
        TM = max(8, _round_up(TM // 2, 8))
        grid_m = pl.cdiv(B, TM)

    bytes_accessed = (
        B * K * x.dtype.itemsize            # x streamed at true width, no host pad/cast
        + w01p.size * 2 + w2p.size * 2      # bf16 weights (VMEM-resident across grid)
        + (Hp + Np) * 4                     # f32 biases
        + B * Np * 2                        # bf16 output writeback
    )

    out = pl.pallas_call(
        bpnn_kernel,
        out_shape=jax.ShapeDtypeStruct((B, Np), jnp.bfloat16),
        grid=(grid_m,),
        in_specs=[
            pl.BlockSpec((TM, K), lambda i: (i, 0)),   # x: batch-tiled, pipelined, true K
            pl.BlockSpec((K, Hp), lambda i: (0, 0)),   # W01: VMEM-resident across grid
            pl.BlockSpec((1, Hp), lambda i: (0, 0)),   # b01: VMEM-resident
            pl.BlockSpec((Hp, Np), lambda i: (0, 0)),  # W2: VMEM-resident
            pl.BlockSpec((1, Np), lambda i: (0, 0)),   # b2: VMEM-resident
        ],
        out_specs=pl.BlockSpec((TM, Np), lambda i: (i, 0)),
        compiler_params=pltpu.CompilerParams(
            dimension_semantics=("parallel",),          # megacore / v7x dual-TC sharding
            vmem_limit_bytes=32 * 1024 * 1024,          # safe on all generations (v7x: 64 MiB)
        ),
        cost_estimate=pl.CostEstimate(
            flops=2 * B * (K * Hp + Hp * Np),
            transcendentals=0,
            bytes_accessed=int(bytes_accessed),
        ),
    )(x, w01p, b01p, w2p, b2p)
    # TODO(synk): if hidden dims are ever scaled up (e.g. 4k x 4k bf16 weights), tile
    # H/N instead of keeping both weights VMEM-resident and re-budget against
    # pltpu.get_tpu_info().vmem_capacity_bytes (v7x has only 64 MiB per TensorCore).
    return out[:, :N].astype(jnp.float32)   # strip lane padding, restore module's f32 output


def init_linear(key, fan_in, fan_out):
    # Deterministic init mimicking nn.Linear's uniform(-1/sqrt(fan_in), 1/sqrt(fan_in)).
    kw, kb = jax.random.split(key)
    bound = 1.0 / jnp.sqrt(jnp.float32(fan_in))
    w = jax.random.uniform(kw, (fan_in, fan_out), jnp.float32, -bound, bound)
    b = jax.random.uniform(kb, (1, fan_out), jnp.float32, -bound, bound)
    return w, b


if __name__ == "__main__":
    # Shapes consistent with BPNN(input_size=16, hidden_size=[32, 32], output_size=8).
    # batch=256 so the Pallas path is exercised with a 2-step batch grid (128-row tiles).
    batch, input_size, hidden_size, output_size = 256, 16, [32, 32], 8

    key = jax.random.PRNGKey(0)
    k_x, k0, k1, k2 = jax.random.split(key, 4)

    x = jax.random.normal(k_x, (batch, input_size), jnp.float32)
    params = [
        init_linear(k0, input_size, hidden_size[0]),
        init_linear(k1, hidden_size[0], hidden_size[1]),
        init_linear(k2, hidden_size[1], output_size),
    ]

    prepared, dims = prepare_params(params)
    out = bpnn_forward(x, prepared, dims)
    out = jax.block_until_ready(out)

    # Pure-JAX f32 reference of the original (unfolded) layer sequence.
    (w0, b0), (w1, b1), (w2, b2) = params
    h = x @ w0 + b0
    h = jnp.maximum(h @ w1 + b1, 0.0)
    ref = h @ w2 + b2
    assert out.shape == (batch, output_size)
    # bf16 weights + bf16 output writeback with f32 accumulation: loosened tolerance.
    assert jnp.allclose(out, ref, atol=2e-2, rtol=2e-2), float(jnp.max(jnp.abs(out - ref)))

    print("KERNEL_OK")
</pallas_src>

<mosaic_0001>
module attributes {stable_mosaic.version = 11 : i64} {
  func.func @bpnn_kernel(%arg0: i32, %arg1: memref<128x16xf32, #tpu.memory_space<vmem>>, %arg2: memref<16x128xbf16, #tpu.memory_space<vmem>>, %arg3: memref<1x128xf32, #tpu.memory_space<vmem>>, %arg4: memref<128x128xbf16, #tpu.memory_space<vmem>>, %arg5: memref<1x128xf32, #tpu.memory_space<vmem>>, %arg6: memref<128x128xbf16, #tpu.memory_space<vmem>>) attributes {dimension_semantics = [#tpu.dimension_semantics<parallel>], iteration_bounds = array<i64: 2>, scalar_prefetch = 0 : i64, scratch_operands = 0 : i64, tpu.core_type = #tpu.core_type<tc>, window_params = [{transform_indices = @transform_0, window_bounds = array<i64: 128, 16>}, {pipeline_mode = #tpu.pipeline_mode<synchronous>, transform_indices = @transform_1, window_bounds = array<i64: 16, 128>}, {pipeline_mode = #tpu.pipeline_mode<synchronous>, transform_indices = @transform_2, window_bounds = array<i64: 1, 128>}, {pipeline_mode = #tpu.pipeline_mode<synchronous>, transform_indices = @transform_3, window_bounds = array<i64: 128, 128>}, {pipeline_mode = #tpu.pipeline_mode<synchronous>, transform_indices = @transform_4, window_bounds = array<i64: 1, 128>}, {transform_indices = @transform_5, window_bounds = array<i64: 128, 128>}]} {
    %c0 = arith.constant 0 : index
    %c0_0 = arith.constant 0 : index
    %0 = vector.load %arg1[%c0, %c0_0] : memref<128x16xf32, #tpu.memory_space<vmem>>, vector<128x16xf32>
    %1 = arith.truncf %0 : vector<128x16xf32> to vector<128x16xbf16>
    %c0_1 = arith.constant 0 : index
    %c0_2 = arith.constant 0 : index
    %2 = vector.load %arg2[%c0_1, %c0_2] : memref<16x128xbf16, #tpu.memory_space<vmem>>, vector<16x128xbf16>
    %cst = arith.constant dense<0.000000e+00> : vector<128x128xf32>
    %3 = tpu.matmul %1, %2, %cst {dimension_numbers = #tpu.dot_dimension_numbers<[1], [0], [0], [1], [0, 0, 1, 1], [], []>} : vector<128x16xbf16>, vector<16x128xbf16>, vector<128x128xf32> -> vector<128x128xf32>
    %c0_3 = arith.constant 0 : index
    %c0_4 = arith.constant 0 : index
    %4 = vector.load %arg3[%c0_3, %c0_4] : memref<1x128xf32, #tpu.memory_space<vmem>>, vector<1x128xf32>
    %5 = vector.broadcast %4 : vector<1x128xf32> to vector<128x128xf32>
    %6 = arith.addf %3, %5 : vector<128x128xf32>
    %cst_5 = arith.constant 0.000000e+00 : f32
    %7 = vector.broadcast %cst_5 : f32 to vector<128x128xf32>
    %8 = arith.maximumf %6, %7 : vector<128x128xf32>
    %9 = arith.truncf %8 : vector<128x128xf32> to vector<128x128xbf16>
    %c0_6 = arith.constant 0 : index
    %c0_7 = arith.constant 0 : index
    %10 = vector.load %arg4[%c0_6, %c0_7] : memref<128x128xbf16, #tpu.memory_space<vmem>>, vector<128x128xbf16>
    %cst_8 = arith.constant dense<0.000000e+00> : vector<128x128xf32>
    %11 = tpu.matmul %9, %10, %cst_8 {dimension_numbers = #tpu.dot_dimension_numbers<[1], [0], [0], [1], [0, 0, 1, 1], [], []>} : vector<128x128xbf16>, vector<128x128xbf16>, vector<128x128xf32> -> vector<128x128xf32>
    %c0_9 = arith.constant 0 : index
    %c0_10 = arith.constant 0 : index
    %12 = vector.load %arg5[%c0_9, %c0_10] : memref<1x128xf32, #tpu.memory_space<vmem>>, vector<1x128xf32>
    %13 = vector.broadcast %12 : vector<1x128xf32> to vector<128x128xf32>
    %14 = arith.addf %11, %13 : vector<128x128xf32>
    %15 = arith.truncf %14 : vector<128x128xf32> to vector<128x128xbf16>
    %c0_11 = arith.constant 0 : index
    %c0_12 = arith.constant 0 : index
    %16 = vector.load %arg6[%c0_11, %c0_12] : memref<128x128xbf16, #tpu.memory_space<vmem>>, vector<128x128xbf16>
    tpu.vector_store %arg6[%c0_11, %c0_12], %15 {strides = array<i32>} : memref<128x128xbf16, #tpu.memory_space<vmem>>, vector<128x128xbf16>,
    return
  }
  func.func @transform_0(%arg0: i32) -> (i32, i32) {
    %c0_i32 = arith.constant 0 : i32
    %c0_i32_0 = arith.constant 0 : i32
    return %arg0, %c0_i32 : i32, i32
  }
  func.func @transform_1(%arg0: i32) -> (i32, i32) {
    %c0_i32 = arith.constant 0 : i32
    %c0_i32_0 = arith.constant 0 : i32
    %c0_i32_1 = arith.constant 0 : i32
    return %c0_i32, %c0_i32_0 : i32, i32
  }
  func.func @transform_2(%arg0: i32) -> (i32, i32) {
    %c0_i32 = arith.constant 0 : i32
    %c0_i32_0 = arith.constant 0 : i32
    %c0_i32_1 = arith.constant 0 : i32
    return %c0_i32, %c0_i32_0 : i32, i32
  }
  func.func @transform_3(%arg0: i32) -> (i32, i32) {
    %c0_i32 = arith.constant 0 : i32
    %c0_i32_0 = arith.constant 0 : i32
    %c0_i32_1 = arith.constant 0 : i32
    return %c0_i32, %c0_i32_0 : i32, i32
  }
  func.func @transform_4(%arg0: i32) -> (i32, i32) {
    %c0_i32 = arith.constant 0 : i32
    %c0_i32_0 = arith.constant 0 : i32
    %c0_i32_1 = arith.constant 0 : i32
    return %c0_i32, %c0_i32_0 : i32, i32
  }
  func.func @transform_5(%arg0: i32) -> (i32, i32) {
    %c0_i32 = arith.constant 0 : i32
    %c0_i32_0 = arith.constant 0 : i32
    return %arg0, %c0_i32 : i32, i32
  }
}

</mosaic_0001>

<bundles_post_ra>
// kernel: tpu_custom_call.1
= control target key start
LH: loop header
LB: loop body
LE: loop exit
PB: predicated region body
PF: predicated region fallthrough
CT: control target
= control target key end

     0   :  { %10 = vsyncpa [#allocation3], 0  ;;  %s1258_s0 = inlined_call_operand.vmem [shape: f32[256,16], index: 0, kind: input, shape index: {}]   ;;  %s1259_s1 = inlined_call_operand.vmem [shape: bf16[16,128], index: 1, kind: input, shape index: {}]   ;;  %s1260_s2 = inlined_call_operand.vmem [shape: f32[1,128], index: 2, kind: input, shape index: {}]   ;;  %s1261_s3 = inlined_call_operand.vmem [shape: bf16[128,128], index: 3, kind: input, shape index: {}]   ;;  %s1262_s4 = inlined_call_operand.vmem [shape: f32[1,128], index: 4, kind: input, shape index: {}]   ;;  %s1263_s5 = inlined_call_operand.hbm [shape: bf16[256,128], index: 5, kind: output, shape index: {}]  }
   0x1   :  { %12 = vsyncpa [#allocation3 + $0x1], 0  ;;  %s1083_s18 = smov 0   ;;  %s1085_s19 = smov 0  }
   0x2   :  { %s1087_s20 = smov 0   ;;  %s1089_s21 = smov 0  }
   0x3 LB: > { %s1104_s22 = sadd.s32 4294967295, %s1048_s21   ;;  %s736_s23 = sadd.s32 4294967294, %s1048_s21   ;;  %s1048_s21 = sphi %s1089_s21, %s1269_s21   ;;  %s1044_s20 = sphi %s1087_s20, %s1268_s20   ;;  %s1040_s19 = sphi %s1085_s19, %s1267_s19   ;;  %s1036_s18 = sphi %s1083_s18, %s1266_s18  }
   0x4   : > { %s1108_s24 = sadd.s32 1, %s1048_s21   ;;  %s135_s25 = sadd.s32 1, %s1044_s20 }
   0x5   : > { %s132_s26 = ssub.s32 %s1048_s21, %s1108_s24  ;;  %p145_p0 = scmp.ne.s32.totalorder %s1044_s20, %s1040_s19 }
   0x6   : > { %p133_p1 = scmp.eq.s32.totalorder %s132_s26, 0  ;;  %p146_p2 = scmp.eq.s32.totalorder %s1104_s22, 1 }
   0x7   : > { %p151_p3 = scmp.ne.s32.totalorder %s1040_s19, %s1036_s18  ;;  %p152_p4 = scmp.eq.s32.totalorder %s736_s23, 1 }
   0x8   : > { %s1119_s27 = scalar_select %p133_p1, %s1044_s20, %s135_s25  }
   0x9   : > { %p1121_p5 = por %p146_p2, %p145_p0  ;;  %p1125_p6 = por %p152_p4, %p151_p3 }
   0xa   : > { %p739_p7 = scmp.ge.s32.totalorder %s1048_s21, 1  ;;  %p191_p8 = scmp.lt.s32.totalorder %s1048_s21, 3 }
   0xc   : > { %p192_p9 = pnand %p739_p7, %p191_p8 }
   0xd   : > { %s741_s7 = sshll.u32 (!%p192_p9), %s1104_s22, 4  ;;  %s216_s14 = sand.u32 (!%p192_p9), 1, %s1040_s19  }
   0xe   : > { %195 = sbr.rel (%p192_p9) target bundleno = 473 (0x1d9), region = 40  ;;  %p220_p10 = scmp.lt.s32.totalorder (!%p192_p9), %s741_s7, 31 }
   0xf   : > { %s740_s17 = sshll.u32 (!%p192_p9), %s216_s14, 6  ;;  %s799_s25 = sshll.u32 (!%p192_p9), %s1104_s22, 10 }
  0x10   : > { %s1197_s23 = scalar_lea.vmem (!%p192_p9), [#allocation2], %s740_s17  ;;  %s1218_s22 = scalar_lea.sflag (!%p192_p9), [#allocation3], %s216_s14 }
  0x11   : > { %s674_s26 = sshll.u32 (!%p192_p9), %s1197_s23, 4  ;;  %s1050_s9 = smov (!%p192_p9), [#allocation2]   ;;  %s1212_s26 = int_to_ptr.vmem [resolvable:$true] %s674_s26 }
  0x12   : > { %s988_s8 = scalar_lea.vmem (!%p192_p9), %s1212_s26, 1024  ;;  %s992_s10 = sshll.u32 (!%p192_p9), %s1050_s9, 4  ;;  %s993_s10 = int_to_ptr.vmem [resolvable:$false] %s992_s10 }
  0x13   : > { %v979_v0 = vld [vmem:[%s1259_s1] sm:$0xff]   ;;  %v980_v1 = vld [vmem:[%s1261_s3 + $0x38] sm:$0xff]   ;;  %s1271_s7 = smov (!%p220_p10, %s741_s7), 31  ;;  %v981_v2 = vld [vmem:[%s1261_s3 + $0x30] sm:$0xff]   ;;  %vm266_vm0 = vcmask 130048   ;;  %p989_p11 = scmp.ne.s32.totalorder %s1212_s26, %s988_s8 }
  0x14   : > { %872 = vmatprep.subr.bf16.mxu0 %v979_v0  ;;  %922 = vmatprep.subr.bf16.mxu1 %v980_v1  ;;  %s742_s12 = sshll.u32 %s1271_s7, 3  ;;  %v982_v3 = vld [vmem:[%s1261_s3 + $0x28] sm:$0xff]   ;;  %v983_v15 = vld [vmem:[%s1261_s3 + $0x20] sm:$0xff]   ;;  %v984_v20 = vld [vmem:[%s1261_s3 + $0x18] sm:$0xff]   ;;  %s1210_s7 = scalar_lea.hbm %s1263_s5, %s799_s25 }
  0x15   : > { %873 = vmatpush3.bf16.msra.mxu0 %v979_v0  ;;  %930 = vmatpush3.bf16.msra.mxu1 %v980_v1  ;;  %s1144_s15 = scalar_lea.vmem %s1258_s0, %s742_s12  ;;  %v985_v30 = vld [vmem:[%s1261_s3 + $0x10] sm:$0xff]   ;;  %v986_v31 = vld [vmem:[%s1261_s3 + $0x8] sm:$0xff]   ;;  %v987_v32 = vld [vmem:[%s1261_s3] sm:$0xff]   ;;  %p990_p12 = pnand %p989_p11, %p1121_p5 }
  0x16   : > { %890 = vmatprep.subr.bf16.mxu0 %v980_v1  ;;  %923 = vmatprep.subr.bf16.mxu1 %v981_v2  ;;  %v227_v4 = vld [vmem:[%s1144_s15] sm:$0xff]  ;;  %v228_v5 = vld [vmem:[%s1144_s15 + $0x8] sm:$0xff]  ;;  %v229_v6 = vld [vmem:[%s1144_s15 + $0x10] sm:$0xff]  ;;  %s994_s11 = scalar_lea.vmem %s993_s10, 2048  ;;  %p995_p0 = scmp.lt.s32.totalorder %s1212_s26, %s993_s10 }
  0x17   : > { %v243_v7 = vpack.c.bf16 %v228_v5, %v227_v4  ;;  %v230_v8 = vld [vmem:[%s1144_s15 + $0x18] sm:$0xff]  ;;  %v231_v9 = vld [vmem:[%s1144_s15 + $0x20] sm:$0xff]  ;;  %v232_v10 = vld [vmem:[%s1144_s15 + $0x28] sm:$0xff]  ;;  %p991_p13 = pneg %p990_p12  ;;  %p996_p1 = scmp.lt.s32.totalorder %s994_s11, %s988_s8 }
  0x18   : > { %v244_v11 = vpack.c.bf16 %v230_v8, %v229_v6  ;;  %v245_v12 = vpack.c.bf16 %v232_v10, %v231_v9  ;;  %v233_v13 = vld [vmem:[%s1144_s15 + $0x30] sm:$0xff]  ;;  %v234_v14 = vld [vmem:[%s1144_s15 + $0x38] sm:$0xff]  ;;  %v235_v16 = vld [vmem:[%s1144_s15 + $0x40] sm:$0xff] }
  0x19   : > { %931 = vmatpush3.bf16.msra.mxu1 %v981_v2  ;;  %874 = vmatprep.mubr.msk.bf16.mxu0 %vm266_vm0, %v243_v7  ;;  %v236_v17 = vld [vmem:[%s1144_s15 + $0x48] sm:$0xff]  ;;  %v246_v18 = vpack.c.bf16 %v234_v14, %v233_v13  ;;  %v237_v21 = vld [vmem:[%s1144_s15 + $0x50] sm:$0xff]  ;;  %v238_v22 = vld [vmem:[%s1144_s15 + $0x58] sm:$0xff]  ;;  %p997_p2 = por %p996_p1, %p995_p0 }
  0x1a   : > { %924 = vmatprep.subr.bf16.mxu1 %v982_v3  ;;  %875 = vmatmul.mubr.msk.bf16.vlgmr.msra.gmra.mxu0 %vm266_vm0, %v244_v11  ;;  %v247_v19 = vpack.c.bf16 %v236_v17, %v235_v16  ;;  %v239_v23 = vld [vmem:[%s1144_s15 + $0x60] sm:$0xff]  ;;  %v240_v24 = vld [vmem:[%s1144_s15 + $0x68] sm:$0xff]  ;;  %v248_v25 = vpack.c.bf16 %v238_v22, %v237_v21  ;;  %v241_v27 = vld [vmem:[%s1144_s15 + $0x70] sm:$0xff] }
  0x1b   : > { %878 = vmatprep.mubr.msk.bf16.mxu0 %vm266_vm0, %v245_v12  ;;  %891 = vmatpush3.bf16.msra.mxu0 %v980_v1  ;;  %v249_v26 = vpack.c.bf16 %v240_v24, %v239_v23  ;;  %v242_v28 = vld [vmem:[%s1144_s15 + $0x78] sm:$0xff]  ;;  %v743_v35 = vld [vmem:[%s1260_s2] ss:$0 sm:$0xff]  ;;  %p998_p3 = pnand %p997_p2, %p991_p13 }
  0x1c   : > { %892 = vmatprep.subr.bf16.mxu0 %v981_v2  ;;  %v250_v29 = vpack.c.bf16 %v242_v28, %v241_v27  ;;  %v753_v27 = vld [vmem:[%s1262_s4] ss:$0 sm:$0xff] }
  0x1d   : > { %932 = vmatpush3.bf16.msra.mxu1 %v982_v3 }
  0x1e   : > { %925 = vmatprep.subr.bf16.mxu1 %v983_v15 }
  0x1f   : > { %893 = vmatpush3.bf16.msra.mxu0 %v981_v2 }
  0x20   : > { %894 = vmatprep.subr.bf16.mxu0 %v982_v3 }
  0x21   : > { %933 = vmatpush3.bf16.msra.mxu1 %v983_v15 }
  0x22   : > { %926 = vmatprep.subr.bf16.mxu1 %v984_v20  ;;  %879 = vmatmul.mubr.msk.bf16.gmra.mxu0 %vm266_vm0, %v246_v18 }
  0x23   : > { %882 = vmatprep.mubr.msk.bf16.mxu0 %vm266_vm0, %v247_v19  ;;  %895 = vmatpush3.bf16.msra.mxu0 %v982_v3 }
  0x24   : > { %896 = vmatprep.subr.bf16.mxu0 %v983_v15 }
  0x25   : > { %934 = vmatpush3.bf16.msra.mxu1 %v984_v20 }
  0x26   : > { %927 = vmatprep.subr.bf16.mxu1 %v985_v30 }
  0x27   : > { %897 = vmatpush3.bf16.msra.mxu0 %v983_v15 }
  0x28   : > { %898 = vmatprep.subr.bf16.mxu0 %v984_v20 }
  0x29   : > { %935 = vmatpush3.bf16.msra.mxu1 %v985_v30 }
  0x2a   : > { %883 = vmatmul.mubr.msk.bf16.gmra.mxu0 %vm266_vm0, %v248_v25  ;;  %928 = vmatprep.subr.bf16.mxu1 %v986_v31 }
  0x2b   : > { %886 = vmatprep.mubr.msk.bf16.mxu0 %vm266_vm0, %v249_v26  ;;  %899 = vmatpush3.bf16.msra.mxu0 %v984_v20 }
  0x2c   : > { %900 = vmatprep.subr.bf16.mxu0 %v985_v30 }
  0x2d   : > { %936 = vmatpush3.bf16.msra.mxu1 %v986_v31 }
  0x2e   : > { %929 = vmatprep.subr.bf16.mxu1 %v987_v32 }
  0x2f   : > { %901 = vmatpush3.bf16.msra.mxu0 %v985_v30 }
  0x30   : > { %902 = vmatprep.subr.bf16.mxu0 %v986_v31 }
  0x31   : > { %937 = vmatpush3.bf16.msra.mxu1 %v987_v32 }
  0x32   : > { %887 = vmatmul.mubr.msk.bf16.gmra.mxu0 %vm266_vm0, %v250_v29 }
  0x33   : > { %903 = vmatpush3.bf16.msra.mxu0 %v986_v31 }
  0x34   : > { %904 = vmatprep.subr.bf16.mxu0 %v987_v32 }
  0x37   : > { %905 = vmatpush3.bf16.msra.mxu0 %v987_v32 }
  0xda   : > { %v876_v33 = vpop.f32.mrf.mxu0 }
  0xdb   : > { %v334_v39 = vadd.f32 %v876_v33, %v743_v35 }
  0xdc   : > { %v325_v34 = vpop.f32.mrf.mxu0 }
  0xdd   : > { %v326_v37 = vadd.f32 %v743_v35, %v325_v34  ;;  %v390_v46 = vmax.f32 %v334_v39, 0.0 }
  0xde   : > { %v877_v36 = vpop.f32.mrf.mxu0 }
  0xdf   : > { %v337_v38 = vadd.f32 %v877_v36, %v743_v35  ;;  %v388_v44 = vmax.f32 %v326_v37, 0.0 }
  0xe0   : > { %v328_v40 = vpop.f32.mrf.mxu0 }
  0xe1   : > { %v329_v41 = vadd.f32 %v743_v35, %v328_v40  ;;  %v391_v42 = vmax.f32 %v337_v38, 0.0 }
  0xe2   : > { %v880_v43 = vpop.f32.mrf.mxu0 }
  0xe3   : > { %v389_v45 = vmax.f32 %v329_v41, 0.0  ;;  %v405_v49 = vpack.c.bf16 %v391_v42, %v390_v46  ;;  %v350_v53 = vadd.f32 %v880_v43, %v743_v35 }
  0xe4   : > { %v341_v47 = vpop.f32.mrf.mxu0 }
  0xe5   : > { %v404_v48 = vpack.c.bf16 %v389_v45, %v388_v44  ;;  %v342_v51 = vadd.f32 %v743_v35, %v341_v47  ;;  %v394_v60 = vmax.f32 %v350_v53, 0.0 }
  0xe6   : > { %v881_v50 = vpop.f32.mrf.mxu0 }
  0xe7   : > { %v353_v52 = vadd.f32 %v881_v50, %v743_v35  ;;  %906 = vmatprep.mubr.bf16.mxu0 %v404_v48  ;;  %v392_v58 = vmax.f32 %v342_v51, 0.0 }
  0xe8   : > { %v344_v54 = vpop.f32.mrf.mxu0  ;;  %907 = vmatmul.mubr.bf16.vlgmr.msra.gmra.mxu0 %v405_v49 }
  0xe9   : > { %v345_v55 = vadd.f32 %v743_v35, %v344_v54  ;;  %v395_v56 = vmax.f32 %v353_v52, 0.0 }
  0xea   : > { %v884_v57 = vpop.f32.mrf.mxu0 }
  0xeb   : > { %v393_v59 = vmax.f32 %v345_v55, 0.0  ;;  %v407_v63 = vpack.c.bf16 %v395_v56, %v394_v60  ;;  %v366_v3 = vadd.f32 %v884_v57, %v743_v35 }
  0xec   : > { %v357_v61 = vpop.f32.mrf.mxu0 }
  0xed   : > { %v406_v62 = vpack.c.bf16 %v393_v59, %v392_v58  ;;  %v358_v1 = vadd.f32 %v743_v35, %v357_v61  ;;  %v398_v10 = vmax.f32 %v366_v3, 0.0 }
  0xee   : > { %v885_v0 = vpop.f32.mrf.mxu0 }
  0xef   : > { %v369_v2 = vadd.f32 %v885_v0, %v743_v35  ;;  %910 = vmatprep.mubr.bf16.mxu1 %v406_v62  ;;  %v396_v8 = vmax.f32 %v358_v1, 0.0 }
  0xf0   : > { %v360_v4 = vpop.f32.mrf.mxu0  ;;  %911 = vmatmul.mubr.bf16.vlgmr.msra.gmra.mxu1 %v407_v63 }
  0xf1   : > { %v361_v5 = vadd.f32 %v743_v35, %v360_v4  ;;  %v399_v6 = vmax.f32 %v369_v2, 0.0 }
  0xf2   : > { %v888_v7 = vpop.f32.mrf.mxu0 }
  0xf3   : > { %v397_v9 = vmax.f32 %v361_v5, 0.0  ;;  %v409_v13 = vpack.c.bf16 %v399_v6, %v398_v10  ;;  %v382_v17 = vadd.f32 %v888_v7, %v743_v35 }
  0xf4   : > { %v373_v11 = vpop.f32.mrf.mxu0 }
  0xf5   : > { %v408_v12 = vpack.c.bf16 %v397_v9, %v396_v8  ;;  %v374_v15 = vadd.f32 %v743_v35, %v373_v11  ;;  %v402_v23 = vmax.f32 %v382_v17, 0.0 }
  0xf6   : > { %v889_v14 = vpop.f32.mrf.mxu0 }
  0xf7   : > { %v385_v16 = vadd.f32 %v889_v14, %v743_v35  ;;  %914 = vmatprep.mubr.bf16.mxu1 %v408_v12  ;;  %v400_v21 = vmax.f32 %v374_v15, 0.0 }
  0xf8   : > { %v376_v18 = vpop.f32.mrf.mxu0  ;;  %915 = vmatmul.mubr.bf16.gmra.mxu1 %v409_v13 }
  0xf9   : > { %v377_v19 = vadd.f32 %v743_v35, %v376_v18  ;;  %v403_v20 = vmax.f32 %v385_v16, 0.0 }
  0xfb   : > { %v401_v22 = vmax.f32 %v377_v19, 0.0  ;;  %v411_v25 = vpack.c.bf16 %v403_v20, %v402_v23 }
  0xfd   : > { %v410_v24 = vpack.c.bf16 %v401_v22, %v400_v21 }
  0xff   : > { %918 = vmatprep.mubr.bf16.mxu1 %v410_v24 }
 0x100   : > { %919 = vmatmul.mubr.bf16.gmra.mxu1 %v411_v25 }
 0x1a8   : > { %v908_v26 = vpop.f32.mrf.mxu0 }
 0x1a9   : > { %v526_v30 = vadd.f32 %v908_v26, %v753_v27 }
 0x1aa   : > { %v517_v28 = vpop.f32.mrf.mxu0 }
 0x1ab   : > { %v518_v33 = vadd.f32 %v753_v27, %v517_v28 }
 0x1ac   : > { %v909_v29 = vpop.f32.mrf.mxu0 }
 0x1ad   : > { %v529_v31 = vadd.f32 %v909_v29, %v753_v27 }
 0x1ae   : > { %v520_v32 = vpop.f32.mrf.mxu0 }
 0x1af   : > { %v808_v34 = vpack.c.bf16 %v529_v31, %v526_v30  ;;  %v521_v35 = vadd.f32 %v753_v27, %v520_v32 }
 0x1b0   : > { %v912_v36 = vpop.f32.mrf.mxu1 }
 0x1b1   : > { %840 = vst [vmem:[%s1197_s23 + $0x8] sm:$0xff] %v808_v34   ;;  %v803_v37 = vpack.c.bf16 %v521_v35, %v518_v33  ;;  %v542_v40 = vadd.f32 %v912_v36, %v753_v27 }
 0x1b2   : > { %v533_v38 = vpop.f32.mrf.mxu1 }
 0x1b3   : > { %804 = vst [vmem:[%s1197_s23] sm:$0xff] %v803_v37   ;;  %v534_v43 = vadd.f32 %v753_v27, %v533_v38 }
 0x1b4   : > { %v913_v39 = vpop.f32.mrf.mxu1 }
 0x1b5   : > { %v545_v41 = vadd.f32 %v913_v39, %v753_v27 }
 0x1b6   : > { %v536_v42 = vpop.f32.mrf.mxu1 }
 0x1b7   : > { %v818_v44 = vpack.c.bf16 %v545_v41, %v542_v40  ;;  %v537_v45 = vadd.f32 %v753_v27, %v536_v42 }
 0x1b8   : > { %v916_v46 = vpop.f32.mrf.mxu1 }
 0x1b9   : > { %842 = vst [vmem:[%s1197_s23 + $0x18] sm:$0xff] %v818_v44   ;;  %v813_v47 = vpack.c.bf16 %v537_v45, %v534_v43  ;;  %v558_v50 = vadd.f32 %v916_v46, %v753_v27 }
 0x1ba   : > { %v549_v48 = vpop.f32.mrf.mxu1 }
 0x1bb   : > { %841 = vst [vmem:[%s1197_s23 + $0x10] sm:$0xff] %v813_v47   ;;  %v550_v53 = vadd.f32 %v753_v27, %v549_v48 }
 0x1bc   : > { %v917_v49 = vpop.f32.mrf.mxu1 }
 0x1bd   : > { %v561_v51 = vadd.f32 %v917_v49, %v753_v27 }
 0x1be   : > { %v552_v52 = vpop.f32.mrf.mxu1 }
 0x1bf   : > { %v828_v54 = vpack.c.bf16 %v561_v51, %v558_v50  ;;  %v553_v55 = vadd.f32 %v753_v27, %v552_v52 }
 0x1c0   : > { %v920_v56 = vpop.f32.mrf.mxu1 }
 0x1c1   : > { %844 = vst [vmem:[%s1197_s23 + $0x28] sm:$0xff] %v828_v54   ;;  %v823_v57 = vpack.c.bf16 %v553_v55, %v550_v53  ;;  %v574_v60 = vadd.f32 %v920_v56, %v753_v27 }
 0x1c2   : > { %v565_v58 = vpop.f32.mrf.mxu1 }
 0x1c3   : > { %843 = vst [vmem:[%s1197_s23 + $0x20] sm:$0xff] %v823_v57   ;;  %v566_v63 = vadd.f32 %v753_v27, %v565_v58 }
 0x1c4   : > { %v921_v59 = vpop.f32.mrf.mxu1 }
 0x1c5   : > { %v577_v61 = vadd.f32 %v921_v59, %v753_v27 }
 0x1c6   : > { %v568_v62 = vpop.f32.mrf.mxu1 }
 0x1c7   : > { %v838_v0 = vpack.c.bf16 %v577_v61, %v574_v60  ;;  %v569_v1 = vadd.f32 %v753_v27, %v568_v62 }
 0x1c9   : > { %846 = vst [vmem:[%s1197_s23 + $0x38] sm:$0xff] %v838_v0   ;;  %v833_v2 = vpack.c.bf16 %v569_v1, %v566_v63 }
 0x1cb   : > { %845 = vst [vmem:[%s1197_s23 + $0x30] sm:$0xff] %v833_v2  }
 0x1cc   : > { %1001 = shalt.err (!%p998_p3)
}
 0x1cd   : > { %s1002_s12 = scalar_lea.hbm %s1210_s7, 1024  ;;  %s1006_s15 = scalar_lea.hbm %s1263_s5, 2048 }
 0x1ce   : > { %p1003_p4 = scmp.ne.s32.totalorder %s1210_s7, %s1002_s12  ;;  %p1007_p9 = scmp.lt.s32.totalorder %s1210_s7, %s1263_s5 }
 0x1cf   : > { %p1008_p10 = scmp.lt.s32.totalorder %s1006_s15, %s1002_s12 }
 0x1d0   : > { %p1004_p7 = pnand %p1003_p4, %p1121_p5 }
 0x1d1   : > { %p1009_p11 = por %p1008_p10, %p1007_p9 }
 0x1d2   : > { %p1005_p8 = pneg %p1004_p7 }
 0x1d4   : > { %p1010_p12 = pnand %p1009_p11, %p1005_p8 }
 0x1d6   : > { %1013 = shalt.err (!%p1010_p12)
}
 0x1d7   : > { %s1051_s23 = smov 64   ;;  %s1052_s25 = smov 4  }
 0x1d8   : > { %938 = dma.vmem_to_hbm [thread:$0]  (%p1121_p5), %s1212_s26, 1024, %s1210_s7, %s1218_s22, %s1051_s23, %s1051_s23, %s1052_s25  }
 0x1d9 PF: > { %p944_p13 = scmp.ge.s32.totalorder %s1048_s21, 2  ;;  %s689_s30 = sand.u32 1, %s1036_s18  }
 0x1da   : > { %s690_s6 = scalar_lea.sflag [#allocation3], %s689_s30 }
 0x1db   : > { %p941_p0 = pnand %p944_p13, %p1125_p6 }
 0x1dd   : > { %p942_p1 = pneg %p941_p0 }
 0x1df   : > { %1031 = dma.done.wait (%p942_p1), %s690_s6, 1024  }
 0x1e0   : > { %1033 = vsyncadd (%p942_p1), %s690_s6, 4294966272  ;;  %p15_p2 = scmp.ge.s32.totalorder %s1108_s24, 4   ;;  %s1266_s18 = smov %s1040_s19 }
 0x1e1   : > { %s1267_s19 = smov %s1044_s20  ;;  %s1268_s20 = smov %s1119_s27 }
 0x1e2   : > { %s1269_s21 = smov %s1108_s24  ;;  %17 = sbr.rel (!%p15_p2) target bundleno = 3 (0x3), region = 75 }
 0x1e7   :  { %695 = vsyncpa [#allocation3], 1 }
 0x1e8   :  { %697 = vsyncpa [#allocation3 + $0x1], 1 }

</bundles_post_ra>
